<compile_context>
chip_gen: v7x
topology: tpu7x:2x2x1
jax: 0.10.0
libtpu: 0.0.40
codegen_flags: <defaults>
</compile_context>

<pallas_src>
import functools

import jax
import jax.numpy as jnp
from jax.experimental import pallas as pl
from jax.experimental.pallas import tpu as pltpu


def _round_up(x, m):
    return (x + m - 1) // m * m


# ----------------------------------------------------------------------------
# Fused kernel: 3x3 conv (stride 1, pad 1) + folded BN + ReLU + global-avg-
# pool + 1x1 atten conv + bn_atten + sigmoid + broadcast multiply.
# One grid step = one image.
# ----------------------------------------------------------------------------
def _arm_fused_kernel(x_ref, w_ref, b_ref, w1_ref, b1_ref, out_ref, acc_ref,
                      *, H, W, Cout):
    # x_ref  : (1, H+2, W, Kp)   bf16  kw-packed, zero halo rows/cols baked in
    # w_ref  : (3, Kp, Coutp)    bf16  per-kh weights, BN scale folded in
    # b_ref  : (1, Coutp)        f32   BN shift
    # w1_ref : (Coutp, Coutp)    f32   atten 1x1 conv [in, out]; bn_atten scale
    #                                  and 1/(H*W) folded in
    # b1_ref : (1, Coutp)        f32   bn_atten shift
    # out_ref: (1, Cout, H*W)    bf16  channel-major output
    # acc_ref: (H*W, Coutp)      f32   VMEM scratch accumulator
    HW = H * W
    Kp = x_ref.shape[-1]

    # 3 dense tap-GEMMs (one per kh); leading-dim slices are free views and
    # the (H, W, Kp) -> (H*W, Kp) reshape is sublane-aligned (W % 8 == 0).
    acc_ref[...] = jnp.dot(x_ref[0, 0:H].reshape(HW, Kp), w_ref[0],
                           preferred_element_type=jnp.float32)
    acc_ref[...] += jnp.dot(x_ref[0, 1:1 + H].reshape(HW, Kp), w_ref[1],
                            preferred_element_type=jnp.float32)
    acc_ref[...] += jnp.dot(x_ref[0, 2:2 + H].reshape(HW, Kp), w_ref[2],
                            preferred_element_type=jnp.float32)

    # Fused BN shift + ReLU (f32).
    y = jnp.maximum(acc_ref[...] + b_ref[...], 0.0)          # (HW, Coutp)

    # Global average pool (spatial sum; 1/HW is folded into w1).
    gap = jnp.sum(y, axis=0, keepdims=True)                   # (1, Coutp)

    # 1x1 attention conv + bn_atten + sigmoid (tiny GEMM, EUP sigmoid).
    atten = jax.nn.sigmoid(
        jnp.dot(gap, w1_ref[...], preferred_element_type=jnp.float32)
        + b1_ref[...])                                         # (1, Coutp)

    # Broadcast multiply, transpose to channel-major, drop padded channels,
    # cast to bf16, single lane-dense store.
    out_t = jnp.transpose(y * atten)                           # (Coutp, HW)
    out_ref[0] = out_t[:Cout].astype(out_ref.dtype)


# ----------------------------------------------------------------------------
# Wrapper: AttentionRefinementModule forward (NCHW in / NCHW out)
# ----------------------------------------------------------------------------
def arm_forward(x_nchw, params):
    N, Cin, H, W = x_nchw.shape
    w_conv = params["conv_w"]                       # (Cout, Cin, 3, 3)
    Cout = w_conv.shape[0]
    K = 3 * Cin                                     # kw-packed contraction
    Kp = _round_up(K, 128)
    Coutp = _round_up(Cout, 128)
    HW = H * W
    eps = 1e-5
    # Note: W % 8 == 0 keeps the in-kernel (H, W, Kp)->(HW, Kp) reshape
    # relayout-free (true for typical BiSeNet feature maps and the toy shape).

    # ---- host-side prep: NHWC + halo pad + pack the 3 kw taps into K ----
    x = jnp.transpose(x_nchw, (0, 2, 3, 1)).astype(jnp.float32)
    xpad = jnp.pad(x, ((0, 0), (1, 1), (1, 1), (0, 0)))        # (N, H+2, W+2, Cin)
    # xk[n, h, w, kw*Cin + ci] = xpad[n, h, w + kw, ci]
    xk = jnp.concatenate([xpad[:, :, kw:kw + W, :] for kw in range(3)], axis=-1)
    xk = jnp.pad(xk, ((0, 0), (0, 0), (0, 0), (0, Kp - K))).astype(jnp.bfloat16)
    # xk: (N, H+2, W, Kp) bf16

    # ---- conv weights: fold BN scale, pack kw into K, pad, bf16 ----
    bn_scale = params["bn_gamma"] / jnp.sqrt(params["bn_var"] + eps)
    bn_shift = params["bn_beta"] - params["bn_mean"] * bn_scale
    w = jnp.transpose(w_conv, (2, 3, 1, 0)) * bn_scale[None, None, None, :]
    w = w.reshape(3, K, Cout)                                  # [kh, kw*Cin+ci, co]
    w = jnp.pad(w, ((0, 0), (0, Kp - K), (0, Coutp - Cout))).astype(jnp.bfloat16)
    b = jnp.pad(bn_shift, (0, Coutp - Cout)).reshape(1, Coutp).astype(jnp.float32)

    # ---- attention 1x1 conv: fold 1/HW and bn_atten scale into the weight ----
    bna_scale = params["bna_gamma"] / jnp.sqrt(params["bna_var"] + eps)
    bna_shift = params["bna_beta"] - params["bna_mean"] * bna_scale
    w1 = jnp.transpose(params["atten_w"], (1, 0)) * bna_scale[None, :] / float(HW)
    w1 = jnp.pad(w1, ((0, Coutp - Cout), (0, Coutp - Cout))).astype(jnp.float32)
    b1 = jnp.pad(bna_shift, (0, Coutp - Cout)).reshape(1, Coutp).astype(jnp.float32)

    out = pl.pallas_call(
        functools.partial(_arm_fused_kernel, H=H, W=W, Cout=Cout),
        out_shape=jax.ShapeDtypeStruct((N, Cout, HW), jnp.bfloat16),
        grid=(N,),
        in_specs=[
            pl.BlockSpec((1, H + 2, W, Kp), lambda n: (n, 0, 0, 0)),
            pl.BlockSpec((3, Kp, Coutp), lambda n: (0, 0, 0)),
            pl.BlockSpec((1, Coutp), lambda n: (0, 0)),
            pl.BlockSpec((Coutp, Coutp), lambda n: (0, 0)),
            pl.BlockSpec((1, Coutp), lambda n: (0, 0)),
        ],
        out_specs=pl.BlockSpec((1, Cout, HW), lambda n: (n, 0, 0)),
        scratch_shapes=[pltpu.VMEM((HW, Coutp), jnp.float32)],
        compiler_params=pltpu.CompilerParams(dimension_semantics=("parallel",)),
    )(xk, w, b, w1, b1)

    # Channel-major already; only a cheap dim-split remains.
    return out.reshape(N, Cout, H, W)                          # NCHW, bf16


# ----------------------------------------------------------------------------
# Pure-JAX reference (same math, f32) for the correctness check
# ----------------------------------------------------------------------------
def arm_reference(x_nchw, params):
    eps = 1e-5
    y = jax.lax.conv_general_dilated(
        x_nchw, params["conv_w"], window_strides=(1, 1),
        padding=((1, 1), (1, 1)), dimension_numbers=("NCHW", "OIHW", "NCHW"))
    scale = params["bn_gamma"] / jnp.sqrt(params["bn_var"] + eps)
    shift = params["bn_beta"] - params["bn_mean"] * scale
    feat = jnp.maximum(y * scale[None, :, None, None]
                       + shift[None, :, None, None], 0.0)
    atten = jnp.mean(feat, axis=(2, 3), keepdims=True)
    atten = jax.lax.conv_general_dilated(
        atten, params["atten_w"][:, :, None, None], window_strides=(1, 1),
        padding="VALID", dimension_numbers=("NCHW", "OIHW", "NCHW"))
    a_scale = params["bna_gamma"] / jnp.sqrt(params["bna_var"] + eps)
    a_shift = params["bna_beta"] - params["bna_mean"] * a_scale
    atten = jax.nn.sigmoid(atten * a_scale[None, :, None, None]
                           + a_shift[None, :, None, None])
    return feat * atten


# ----------------------------------------------------------------------------
# Deterministic parameters (shapes/init of AttentionRefinementModule.__init__)
# ----------------------------------------------------------------------------
def build_params(key, in_chan, out_chan):
    k1, k2 = jax.random.split(key)
    std1 = float(in_chan * 9) ** -0.5               # kaiming_normal_(a=1), fan_in
    conv_w = jax.random.normal(k1, (out_chan, in_chan, 3, 3), jnp.float32) * std1
    std2 = float(out_chan) ** -0.5
    atten_w = jax.random.normal(k2, (out_chan, out_chan), jnp.float32) * std2
    ones = jnp.ones((out_chan,), jnp.float32)
    zeros = jnp.zeros((out_chan,), jnp.float32)
    # BatchNorm2d right after __init__, eval mode: gamma=1, beta=0, mean=0, var=1
    return {
        "conv_w": conv_w,
        "bn_gamma": ones, "bn_beta": zeros, "bn_mean": zeros, "bn_var": ones,
        "atten_w": atten_w,
        "bna_gamma": ones, "bna_beta": zeros, "bna_mean": zeros, "bna_var": ones,
    }


# ----------------------------------------------------------------------------
if __name__ == "__main__":
    key = jax.random.PRNGKey(0)
    k_param, k_input = jax.random.split(key)

    N, Cin, Cout, H, W = 2, 32, 64, 16, 16
    params = build_params(k_param, Cin, Cout)
    x = jax.random.normal(k_input, (N, Cin, H, W), jnp.float32)

    fwd = jax.jit(lambda inp: arm_forward(inp, params))
    out = fwd(x)
    jax.block_until_ready(out)
    assert out.shape == (N, Cout, H, W)

    ref = arm_reference(x, params)
    max_err = float(jnp.max(jnp.abs(out.astype(jnp.float32) - ref)))
    assert max_err < 4e-2, f"max abs err {max_err}"

    print("KERNEL_OK")
</pallas_src>

<mosaic_0001>
module attributes {stable_mosaic.version = 11 : i64} {
  func.func @_arm_fused_kernel(%arg0: i32, %arg1: memref<1x18x16x128xbf16, #tpu.memory_space<vmem>>, %arg2: memref<3x128x128xbf16, #tpu.memory_space<vmem>>, %arg3: memref<1x128xf32, #tpu.memory_space<vmem>>, %arg4: memref<128x128xf32, #tpu.memory_space<vmem>>, %arg5: memref<1x128xf32, #tpu.memory_space<vmem>>, %arg6: memref<1x64x256xbf16, #tpu.memory_space<vmem>>, %arg7: memref<256x128xf32, #tpu.memory_space<vmem>>) attributes {dimension_semantics = [#tpu.dimension_semantics<parallel>], iteration_bounds = array<i64: 2>, scalar_prefetch = 0 : i64, scratch_operands = 1 : i64, tpu.core_type = #tpu.core_type<tc>, window_params = [{transform_indices = @transform_0, window_bounds = array<i64: 1, 18, 16, 128>}, {pipeline_mode = #tpu.pipeline_mode<synchronous>, transform_indices = @transform_1, window_bounds = array<i64: 3, 128, 128>}, {pipeline_mode = #tpu.pipeline_mode<synchronous>, transform_indices = @transform_2, window_bounds = array<i64: 1, 128>}, {pipeline_mode = #tpu.pipeline_mode<synchronous>, transform_indices = @transform_3, window_bounds = array<i64: 128, 128>}, {pipeline_mode = #tpu.pipeline_mode<synchronous>, transform_indices = @transform_4, window_bounds = array<i64: 1, 128>}, {transform_indices = @transform_5, window_bounds = array<i64: 1, 64, 256>}]} {
    %c0 = arith.constant 0 : index
    %c0_0 = arith.constant 0 : index
    %c0_1 = arith.constant 0 : index
    %c0_2 = arith.constant 0 : index
    %0 = vector.load %arg1[%c0, %c0_0, %c0_1, %c0_2] : memref<1x18x16x128xbf16, #tpu.memory_space<vmem>>, vector<1x16x16x128xbf16>
    %1 = vector.shape_cast %0 : vector<1x16x16x128xbf16> to vector<16x16x128xbf16>
    %2 = vector.shape_cast %1 : vector<16x16x128xbf16> to vector<256x128xbf16>
    %c0_3 = arith.constant 0 : index
    %c0_4 = arith.constant 0 : index
    %c0_5 = arith.constant 0 : index
    %3 = vector.load %arg2[%c0_3, %c0_4, %c0_5] : memref<3x128x128xbf16, #tpu.memory_space<vmem>>, vector<1x128x128xbf16>
    %4 = vector.shape_cast %3 : vector<1x128x128xbf16> to vector<128x128xbf16>
    %cst = arith.constant dense<0.000000e+00> : vector<256x128xf32>
    %5 = tpu.matmul %2, %4, %cst {dimension_numbers = #tpu.dot_dimension_numbers<[1], [0], [0], [1], [0, 0, 1, 1], [], []>} : vector<256x128xbf16>, vector<128x128xbf16>, vector<256x128xf32> -> vector<256x128xf32>
    %c0_6 = arith.constant 0 : index
    %c0_7 = arith.constant 0 : index
    %6 = vector.load %arg7[%c0_6, %c0_7] : memref<256x128xf32, #tpu.memory_space<vmem>>, vector<256x128xf32>
    tpu.vector_store %arg7[%c0_6, %c0_7], %5 {strides = array<i32>} : memref<256x128xf32, #tpu.memory_space<vmem>>, vector<256x128xf32>,
    %c0_8 = arith.constant 0 : index
    %c0_9 = arith.constant 0 : index
    %7 = vector.load %arg7[%c0_8, %c0_9] : memref<256x128xf32, #tpu.memory_space<vmem>>, vector<256x128xf32>
    %c0_10 = arith.constant 0 : index
    %c1 = arith.constant 1 : index
    %c0_11 = arith.constant 0 : index
    %c0_12 = arith.constant 0 : index
    %8 = vector.load %arg1[%c0_10, %c1, %c0_11, %c0_12] : memref<1x18x16x128xbf16, #tpu.memory_space<vmem>>, vector<1x16x16x128xbf16>
    %9 = vector.shape_cast %8 : vector<1x16x16x128xbf16> to vector<16x16x128xbf16>
    %10 = vector.shape_cast %9 : vector<16x16x128xbf16> to vector<256x128xbf16>
    %c1_13 = arith.constant 1 : index
    %c0_14 = arith.constant 0 : index
    %c0_15 = arith.constant 0 : index
    %11 = vector.load %arg2[%c1_13, %c0_14, %c0_15] : memref<3x128x128xbf16, #tpu.memory_space<vmem>>, vector<1x128x128xbf16>
    %12 = vector.shape_cast %11 : vector<1x128x128xbf16> to vector<128x128xbf16>
    %cst_16 = arith.constant dense<0.000000e+00> : vector<256x128xf32>
    %13 = tpu.matmul %10, %12, %cst_16 {dimension_numbers = #tpu.dot_dimension_numbers<[1], [0], [0], [1], [0, 0, 1, 1], [], []>} : vector<256x128xbf16>, vector<128x128xbf16>, vector<256x128xf32> -> vector<256x128xf32>
    %14 = arith.addf %7, %13 : vector<256x128xf32>
    %c0_17 = arith.constant 0 : index
    %c0_18 = arith.constant 0 : index
    %15 = vector.load %arg7[%c0_17, %c0_18] : memref<256x128xf32, #tpu.memory_space<vmem>>, vector<256x128xf32>
    tpu.vector_store %arg7[%c0_17, %c0_18], %14 {strides = array<i32>} : memref<256x128xf32, #tpu.memory_space<vmem>>, vector<256x128xf32>,
    %c0_19 = arith.constant 0 : index
    %c0_20 = arith.constant 0 : index
    %16 = vector.load %arg7[%c0_19, %c0_20] : memref<256x128xf32, #tpu.memory_space<vmem>>, vector<256x128xf32>
    %c0_21 = arith.constant 0 : index
    %c2 = arith.constant 2 : index
    %c0_22 = arith.constant 0 : index
    %c0_23 = arith.constant 0 : index
    %17 = vector.load %arg1[%c0_21, %c2, %c0_22, %c0_23] : memref<1x18x16x128xbf16, #tpu.memory_space<vmem>>, vector<1x16x16x128xbf16>
    %18 = vector.shape_cast %17 : vector<1x16x16x128xbf16> to vector<16x16x128xbf16>
    %19 = vector.shape_cast %18 : vector<16x16x128xbf16> to vector<256x128xbf16>
    %c2_24 = arith.constant 2 : index
    %c0_25 = arith.constant 0 : index
    %c0_26 = arith.constant 0 : index
    %20 = vector.load %arg2[%c2_24, %c0_25, %c0_26] : memref<3x128x128xbf16, #tpu.memory_space<vmem>>, vector<1x128x128xbf16>
    %21 = vector.shape_cast %20 : vector<1x128x128xbf16> to vector<128x128xbf16>
    %cst_27 = arith.constant dense<0.000000e+00> : vector<256x128xf32>
    %22 = tpu.matmul %19, %21, %cst_27 {dimension_numbers = #tpu.dot_dimension_numbers<[1], [0], [0], [1], [0, 0, 1, 1], [], []>} : vector<256x128xbf16>, vector<128x128xbf16>, vector<256x128xf32> -> vector<256x128xf32>
    %23 = arith.addf %16, %22 : vector<256x128xf32>
    %c0_28 = arith.constant 0 : index
    %c0_29 = arith.constant 0 : index
    %24 = vector.load %arg7[%c0_28, %c0_29] : memref<256x128xf32, #tpu.memory_space<vmem>>, vector<256x128xf32>
    tpu.vector_store %arg7[%c0_28, %c0_29], %23 {strides = array<i32>} : memref<256x128xf32, #tpu.memory_space<vmem>>, vector<256x128xf32>,
    %c0_30 = arith.constant 0 : index
    %c0_31 = arith.constant 0 : index
    %25 = vector.load %arg7[%c0_30, %c0_31] : memref<256x128xf32, #tpu.memory_space<vmem>>, vector<256x128xf32>
    %c0_32 = arith.constant 0 : index
    %c0_33 = arith.constant 0 : index
    %26 = vector.load %arg3[%c0_32, %c0_33] : memref<1x128xf32, #tpu.memory_space<vmem>>, vector<1x128xf32>
    %27 = vector.broadcast %26 : vector<1x128xf32> to vector<256x128xf32>
    %28 = arith.addf %25, %27 : vector<256x128xf32>
    %cst_34 = arith.constant 0.000000e+00 : f32
    %29 = vector.broadcast %cst_34 : f32 to vector<256x128xf32>
    %30 = arith.maximumf %28, %29 : vector<256x128xf32>
    %cst_35 = arith.constant dense<0.000000e+00> : vector<128xf32>
    %31 = vector.multi_reduction <add>, %30, %cst_35 [0] : vector<256x128xf32> to vector<128xf32>
    %32 = vector.shape_cast %31 : vector<128xf32> to vector<1x128xf32>
    %c0_36 = arith.constant 0 : index
    %c0_37 = arith.constant 0 : index
    %33 = vector.load %arg4[%c0_36, %c0_37] : memref<128x128xf32, #tpu.memory_space<vmem>>, vector<128x128xf32>
    %cst_38 = arith.constant dense<0.000000e+00> : vector<1x128xf32>
    %34 = tpu.matmul %32, %33, %cst_38 {dimension_numbers = #tpu.dot_dimension_numbers<[1], [0], [0], [1], [0, 0, 1, 1], [], []>} : vector<1x128xf32>, vector<128x128xf32>, vector<1x128xf32> -> vector<1x128xf32>
    %c0_39 = arith.constant 0 : index
    %c0_40 = arith.constant 0 : index
    %35 = vector.load %arg5[%c0_39, %c0_40] : memref<1x128xf32, #tpu.memory_space<vmem>>, vector<1x128xf32>
    %36 = arith.addf %34, %35 : vector<1x128xf32>
    %37 = arith.negf %36 : vector<1x128xf32>
    %38 = math.exp %37 : vector<1x128xf32>
    %cst_41 = arith.constant 1.000000e+00 : f32
    %39 = vector.broadcast %cst_41 : f32 to vector<1x128xf32>
    %40 = arith.addf %39, %38 : vector<1x128xf32>
    %41 = arith.divf %39, %40 : vector<1x128xf32>
    %42 = vector.broadcast %41 : vector<1x128xf32> to vector<256x128xf32>
    %43 = arith.mulf %30, %42 : vector<256x128xf32>
    %44 = tpu.transpose %43, [1, 0] : vector<256x128xf32> -> vector<128x256xf32>
    %45 = vector.extract_strided_slice %44 {offsets = [0, 0], sizes = [64, 256], strides = [1, 1]} : vector<128x256xf32> to vector<64x256xf32>
    %46 = arith.truncf %45 : vector<64x256xf32> to vector<64x256xbf16>
    %c0_42 = arith.constant 0 : index
    %c0_43 = arith.constant 0 : index
    %c0_44 = arith.constant 0 : index
    %47 = vector.load %arg6[%c0_42, %c0_43, %c0_44] : memref<1x64x256xbf16, #tpu.memory_space<vmem>>, vector<1x64x256xbf16>
    %48 = vector.shape_cast %47 : vector<1x64x256xbf16> to vector<64x256xbf16>
    %49 = vector.shape_cast %46 : vector<64x256xbf16> to vector<1x64x256xbf16>
    tpu.vector_store %arg6[%c0_42, %c0_43, %c0_44], %49 {strides = array<i32>} : memref<1x64x256xbf16, #tpu.memory_space<vmem>>, vector<1x64x256xbf16>,
    return
  }
  func.func @transform_0(%arg0: i32) -> (i32, i32, i32, i32) {
    %c0_i32 = arith.constant 0 : i32
    %c0_i32_0 = arith.constant 0 : i32
    %c0_i32_1 = arith.constant 0 : i32
    %c0_i32_2 = arith.constant 0 : i32
    return %arg0, %c0_i32, %c0_i32_0, %c0_i32_1 : i32, i32, i32, i32
  }
  func.func @transform_1(%arg0: i32) -> (i32, i32, i32) {
    %c0_i32 = arith.constant 0 : i32
    %c0_i32_0 = arith.constant 0 : i32
    %c0_i32_1 = arith.constant 0 : i32
    %c0_i32_2 = arith.constant 0 : i32
    return %c0_i32, %c0_i32_0, %c0_i32_1 : i32, i32, i32
  }
  func.func @transform_2(%arg0: i32) -> (i32, i32) {
    %c0_i32 = arith.constant 0 : i32
    %c0_i32_0 = arith.constant 0 : i32
    %c0_i32_1 = arith.constant 0 : i32
    return %c0_i32, %c0_i32_0 : i32, i32
  }
  func.func @transform_3(%arg0: i32) -> (i32, i32) {
    %c0_i32 = arith.constant 0 : i32
    %c0_i32_0 = arith.constant 0 : i32
    %c0_i32_1 = arith.constant 0 : i32
    return %c0_i32, %c0_i32_0 : i32, i32
  }
  func.func @transform_4(%arg0: i32) -> (i32, i32) {
    %c0_i32 = arith.constant 0 : i32
    %c0_i32_0 = arith.constant 0 : i32
    %c0_i32_1 = arith.constant 0 : i32
    return %c0_i32, %c0_i32_0 : i32, i32
  }
  func.func @transform_5(%arg0: i32) -> (i32, i32, i32) {
    %c0_i32 = arith.constant 0 : i32
    %c0_i32_0 = arith.constant 0 : i32
    %c0_i32_1 = arith.constant 0 : i32
    return %arg0, %c0_i32, %c0_i32_0 : i32, i32, i32
  }
}

</mosaic_0001>

<bundles_post_ra>
// kernel: _lambda_.1
= control target key start
LH: loop header
LB: loop body
LE: loop exit
PB: predicated region body
PF: predicated region fallthrough
CT: control target
= control target key end

     0   :  { %s2727_s18 = smov 0   ;;  %s3249_s0 = inlined_call_operand.vmem [shape: bf16[2,18,16,128], index: 0, kind: input, shape index: {}]   ;;  %s3250_s1 = inlined_call_operand.vmem [shape: bf16[3,128,128], index: 1, kind: input, shape index: {}]   ;;  %s3251_s2 = inlined_call_operand.vmem [shape: f32[1,128], index: 2, kind: input, shape index: {}, may-alias: {2,4}]   ;;  %s3252_s3 = inlined_call_operand.vmem [shape: f32[128,128], index: 3, kind: input, shape index: {}]   ;;  %s3253_s4 = inlined_call_operand.vmem [shape: f32[1,128], index: 4, kind: input, shape index: {}, may-alias: {2,4}]   ;;  %s3254_s5 = inlined_call_operand.vmem [shape: bf16[2,64,256], index: 5, kind: output, shape index: {}]  }
   0x1 LB: > { %s1957_s19 = sadd.s32 4294967295, %s2692_s18   ;;  %p1961_p0 = scmp.ge.s32.totalorder %s2692_s18, 1  ;;  %s2692_s18 = sphi %s2727_s18, %s15_s18  }
   0x2   : > { %p187_p1 = scmp.lt.s32.totalorder %s2692_s18, 3 }
   0x4   : > { %p188_p2 = pnand %p1961_p0, %p187_p1 }
   0x5   : > { %v2610_v0 = vld [vmem:[%s3250_s1] sm:$0xff] (!%p188_p2)   ;;  %p215_p3 = scmp.lt.s32.totalorder (!%p188_p2), %s1957_s19, 1  ;;  %v2612_v2 = vld [vmem:[%s3250_s1 + $0x8] sm:$0xff] (!%p188_p2)   ;;  %v2614_v4 = vld [vmem:[%s3250_s1 + $0x10] sm:$0xff] (!%p188_p2)   ;;  %vm2695_vm0 = vmmov (!%p188_p2), 0  }
   0x6   : > { %191 = sbr.rel (%p188_p2) target bundleno = 774 (0x306), region = 40  ;;  %v2741_v1 = vld [vmem:[%s3250_s1 + $0x40] sm:$0xff] (!%p188_p2)   ;;  %2243 = vmatprep.subr.bf16.mxu1 (!%p188_p2), %v2610_v0  ;;  %v2750_v3 = vld [vmem:[%s3250_s1 + $0x48] sm:$0xff] (!%p188_p2)   ;;  %v2760_v5 = vld [vmem:[%s3250_s1 + $0x50] sm:$0xff] (!%p188_p2)  }
   0x7   : > { %2291 = vmatprep.subr.bf16.mxu0 (!%p188_p2), %v2741_v1  ;;  %2244 = vmatpush3.bf16.msra.mxu1 (!%p188_p2), %v2610_v0  ;;  %v2616_v6 = vld [vmem:[%s3250_s1 + $0x18] sm:$0xff] (!%p188_p2)   ;;  %v2618_v8 = vld [vmem:[%s3250_s1 + $0x20] sm:$0xff] (!%p188_p2)   ;;  %v2620_v10 = vld [vmem:[%s3250_s1 + $0x28] sm:$0xff] (!%p188_p2)  }
   0x8   : > { %2292 = vmatpush3.bf16.msra.mxu0 (!%p188_p2), %v2741_v1  ;;  %2245 = vmatprep.subr.bf16.mxu1 (!%p188_p2), %v2612_v2  ;;  %v2772_v7 = vld [vmem:[%s3250_s1 + $0x58] sm:$0xff] (!%p188_p2)   ;;  %v2783_v9 = vld [vmem:[%s3250_s1 + $0x60] sm:$0xff] (!%p188_p2)   ;;  %v2796_v11 = vld [vmem:[%s3250_s1 + $0x68] sm:$0xff] (!%p188_p2)  }
   0x9   : > { %2293 = vmatprep.subr.bf16.mxu0 (!%p188_p2), %v2750_v3  ;;  %v2622_v14 = vld [vmem:[%s3250_s1 + $0x30] sm:$0xff] (!%p188_p2)   ;;  %v2624_v16 = vld [vmem:[%s3250_s1 + $0x38] sm:$0xff] (!%p188_p2)   ;;  %v2630_v19 = vld [vmem:[%s3250_s1 + $0x80] sm:$0xff] (!%p188_p2)  }
   0xa   : > { %v2810_v15 = vld [vmem:[%s3250_s1 + $0x70] sm:$0xff] (!%p188_p2)   ;;  %v2820_v17 = vld [vmem:[%s3250_s1 + $0x78] sm:$0xff] (!%p188_p2)   ;;  %v2631_v21 = vld [vmem:[%s3250_s1 + $0x88] sm:$0xff] (!%p188_p2)  }
   0xb   : > { %2246 = vmatpush3.bf16.msra.mxu1 (!%p188_p2), %v2612_v2  ;;  %v2636_v25 = vld [vmem:[%s3250_s1 + $0x90] sm:$0xff] (!%p188_p2)   ;;  %v2637_v29 = vld [vmem:[%s3250_s1 + $0x98] sm:$0xff] (!%p188_p2)   ;;  %v2642_v31 = vld [vmem:[%s3250_s1 + $0xa0] sm:$0xff] (!%p188_p2)  }
   0xc   : > { %2294 = vmatpush3.bf16.msra.mxu0 (!%p188_p2), %v2750_v3  ;;  %2247 = vmatprep.subr.bf16.mxu1 (!%p188_p2), %v2614_v4  ;;  %v2643_v35 = vld [vmem:[%s3250_s1 + $0xa8] sm:$0xff] (!%p188_p2)   ;;  %v2648_v37 = vld [vmem:[%s3250_s1 + $0xb0] sm:$0xff] (!%p188_p2)   ;;  %v2649_v41 = vld [vmem:[%s3250_s1 + $0xb8] sm:$0xff] (!%p188_p2)  }
   0xd   : > { %s3288_s19 = smov (!%p215_p3, %s1957_s19), 1  ;;  %2295 = vmatprep.subr.bf16.mxu0 %v2760_v5 }
   0xe   : > { %s2526_s11 = smul.u32 144, %s3288_s19  ;;  %s2145_s14 = sshll.u32 %s3288_s19, 6 }
   0xf   : > { %2248 = vmatpush3.bf16.msra.mxu1 %v2614_v4  ;;  %s3236_s17 = scalar_lea.vmem %s3254_s5, %s2145_s14 }
  0x10   : > { %2296 = vmatpush3.bf16.msra.mxu0 %v2760_v5  ;;  %2249 = vmatprep.subr.bf16.mxu1 %v2616_v6  ;;  %s2788_s20 = scalar_lea.vmem %s3249_s0, %s2526_s11 }
  0x11   : > { %2297 = vmatprep.subr.bf16.mxu0 %v2772_v7  ;;  %v2626_v12 = vld [vmem:[%s2788_s20] sm:$0xff]   ;;  %v2627_v13 = vld [vmem:[%s2788_s20 + $0x8] sm:$0xff]   ;;  %v2629_v20 = vld [vmem:[%s2788_s20 + $0x10] sm:$0xff]  }
  0x12   : > { %2259 = vmatprep.mubr.bf16.mxu1 %v2626_v12  ;;  %2307 = vmatprep.mubr.bf16.mxu0 %v2627_v13  ;;  %v2628_v18 = vld [vmem:[%s2788_s20 + $0x8] sm:$0xff]   ;;  %v2632_v22 = vld [vmem:[%s2788_s20 + $0x10] sm:$0xff]   ;;  %v2633_v23 = vld [vmem:[%s2788_s20 + $0x18] sm:$0xff]  }
  0x13   : > { %2250 = vmatpush3.bf16.msra.mxu1 %v2616_v6  ;;  %v2634_v24 = vld [vmem:[%s2788_s20 + $0x18] sm:$0xff]   ;;  %v2635_v26 = vld [vmem:[%s2788_s20 + $0x20] sm:$0xff]   ;;  %v2639_v28 = vld [vmem:[%s2788_s20 + $0x28] sm:$0xff]  }
  0x14   : > { %2298 = vmatpush3.bf16.msra.mxu0 %v2772_v7  ;;  %2251 = vmatprep.subr.bf16.mxu1 %v2618_v8  ;;  %v2638_v27 = vld [vmem:[%s2788_s20 + $0x20] sm:$0xff]   ;;  %v2640_v30 = vld [vmem:[%s2788_s20 + $0x28] sm:$0xff]   ;;  %v2641_v32 = vld [vmem:[%s2788_s20 + $0x30] sm:$0xff]  }
  0x15   : > { %2299 = vmatprep.subr.bf16.mxu0 %v2783_v9  ;;  %v2644_v33 = vld [vmem:[%s2788_s20 + $0x30] sm:$0xff]   ;;  %v2645_v34 = vld [vmem:[%s2788_s20 + $0x38] sm:$0xff]   ;;  %v2647_v38 = vld [vmem:[%s2788_s20 + $0x40] sm:$0xff]  }
  0x16   : > { %v2646_v36 = vld [vmem:[%s2788_s20 + $0x38] sm:$0xff]   ;;  %v2650_v39 = vld [vmem:[%s2788_s20 + $0x40] sm:$0xff]   ;;  %v2651_v40 = vld [vmem:[%s2788_s20 + $0x10] sm:$0xff]  }
  0x17   : > { %2252 = vmatpush3.bf16.msra.mxu1 %v2618_v8  ;;  %v2652_v42 = vld [vmem:[%s2788_s20 + $0x48] sm:$0xff]   ;;  %v2653_v43 = vld [vmem:[%s2788_s20 + $0x18] sm:$0xff]   ;;  %v2654_v44 = vld [vmem:[%s2788_s20 + $0x50] sm:$0xff]  }
  0x18   : > { %2300 = vmatpush3.bf16.msra.mxu0 %v2783_v9  ;;  %2253 = vmatprep.subr.bf16.mxu1 %v2620_v10  ;;  %v2655_v45 = vld [vmem:[%s2788_s20 + $0x20] sm:$0xff]   ;;  %v2656_v46 = vld [vmem:[%s2788_s20 + $0x58] sm:$0xff]   ;;  %v2657_v47 = vld [vmem:[%s2788_s20 + $0x28] sm:$0xff]  }
  0x19   : > { %2301 = vmatprep.subr.bf16.mxu0 %v2796_v11  ;;  %v2658_v48 = vld [vmem:[%s2788_s20 + $0x60] sm:$0xff]   ;;  %v2659_v49 = vld [vmem:[%s2788_s20 + $0x30] sm:$0xff]   ;;  %v2660_v50 = vld [vmem:[%s2788_s20 + $0x68] sm:$0xff]  }
  0x1a   : > { %v2661_v51 = vld [vmem:[%s2788_s20 + $0x38] sm:$0xff]   ;;  %v2662_v52 = vld [vmem:[%s2788_s20 + $0x70] sm:$0xff]   ;;  %v2663_v53 = vld [vmem:[%s2788_s20 + $0x40] sm:$0xff]  }
  0x1b   : > { %2254 = vmatpush3.bf16.msra.mxu1 %v2620_v10  ;;  %v2664_v54 = vld [vmem:[%s2788_s20 + $0x78] sm:$0xff]   ;;  %v2665_v55 = vld [vmem:[%s2788_s20 + $0x48] sm:$0xff]   ;;  %v2667_v57 = vld [vmem:[%s2788_s20 + $0x50] sm:$0xff]  }
  0x1c   : > { %2302 = vmatpush3.bf16.msra.mxu0 %v2796_v11  ;;  %2255 = vmatprep.subr.bf16.mxu1 %v2622_v14  ;;  %v2666_v56 = vld [vmem:[%s2788_s20 + $0x48] sm:$0xff]   ;;  %v2668_v58 = vld [vmem:[%s2788_s20 + $0x50] sm:$0xff]   ;;  %v2669_v59 = vld [vmem:[%s2788_s20 + $0x58] sm:$0xff]  }
  0x1d   : > { %2303 = vmatprep.subr.bf16.mxu0 %v2810_v15  ;;  %v2670_v60 = vld [vmem:[%s2788_s20 + $0x58] sm:$0xff]   ;;  %v2671_v61 = vld [vmem:[%s2788_s20 + $0x60] sm:$0xff]   ;;  %v2673_v63 = vld [vmem:[%s2788_s20 + $0x68] sm:$0xff]  }
  0x1e   : > { %v2672_v62 = vld [vmem:[%s2788_s20 + $0x60] sm:$0xff]   ;;  %v2674_v0 = vld [vmem:[%s2788_s20 + $0x68] sm:$0xff]   ;;  %v2676_v2 = vld [vmem:[%s2788_s20 + $0x70] sm:$0xff]  }
  0x1f   : > { %2256 = vmatpush3.bf16.msra.mxu1 %v2622_v14  ;;  %v2678_v4 = vld [vmem:[%s2788_s20 + $0x78] sm:$0xff]   ;;  %v2680_v6 = vld [vmem:[%s2788_s20 + $0x80] sm:$0xff]   ;;  %v1655_v12 = vld [vmem:[%s3252_s3 + $0x10] sm:$0xff] }
  0x20   : > { %2304 = vmatpush3.bf16.msra.mxu0 %v2810_v15  ;;  %2257 = vmatprep.subr.bf16.mxu1 %v2624_v16  ;;  %v1653_v8 = vld [vmem:[%s3252_s3] sm:$0xff]  ;;  %v1656_v13 = vld [vmem:[%s3252_s3 + $0x18] sm:$0xff] }
  0x21   : > { %2305 = vmatprep.subr.bf16.mxu0 %v2820_v17  ;;  %v2426_v14 = vpack.c.bf16 %v1656_v13, %v1655_v12 }
  0x23   : > { %2258 = vmatpush3.bf16.msra.mxu1 %v2624_v16  ;;  %v1658_v16 = vld [vmem:[%s3252_s3 + $0x28] sm:$0xff] }
  0x24   : > { %2306 = vmatpush3.bf16.msra.mxu0 %v2820_v17  ;;  %2446 = vmatprep.subr.bf16.mxu1 %v2741_v1 }
  0x25   : > { %2339 = vmatprep.subr.bf16.mxu0 %v2630_v19 }
  0x26   : > { %2260 = vmatmul.mubr.bf16.vlgmr.msra.gmra.mrb[0].mxu1 %v2628_v18  ;;  %v1659_v18 = vld [vmem:[%s3252_s3 + $0x30] sm:$0xff] }
  0x27   : > { %2308 = vmatmul.mubr.bf16.vlgmr.msra.gmra.mrb[0].mxu0 %v2629_v20  ;;  %2454 = vmatpush3.bf16.msra.mxu1 %v2741_v1  ;;  %v2675_v1 = vld [vmem:[%s2788_s20 + $0x70] sm:$0xff]  }
  0x28   : > { %2340 = vmatpush3.bf16.msra.mxu0 %v2630_v19  ;;  %2263 = vmatprep.mubr.bf16.mxu1 %v2632_v22  ;;  %v1660_v19 = vld [vmem:[%s3252_s3 + $0x38] sm:$0xff]  ;;  %v1662_v22 = vld [vmem:[%s3252_s3 + $0x48] sm:$0xff] }
  0x29   : > { %2341 = vmatprep.subr.bf16.mxu0 %v2631_v21  ;;  %2311 = vmatprep.mubr.bf16.mxu0 %v2633_v23  ;;  %v2432_v20 = vpack.c.bf16 %v1660_v19, %v1659_v18 }
  0x2a   : > { %2447 = vmatprep.subr.bf16.mxu1 %v2750_v3 }
  0x2b   : > { %2455 = vmatpush3.bf16.msra.mxu1 %v2750_v3  ;;  %v2677_v3 = vld [vmem:[%s2788_s20 + $0x78] sm:$0xff]  }
  0x2c   : > { %2342 = vmatpush3.bf16.msra.mxu0 %v2631_v21  ;;  %2448 = vmatprep.subr.bf16.mxu1 %v2760_v5  ;;  %v1661_v21 = vld [vmem:[%s3252_s3 + $0x40] sm:$0xff] }
  0x2d   : > { %2343 = vmatprep.subr.bf16.mxu0 %v2636_v25  ;;  %v2435_v23 = vpack.c.bf16 %v1662_v22, %v1661_v21 }
  0x2e   : > { %2264 = vmatmul.mubr.bf16.gmra.mrb[4].mxu1 %v2634_v24  ;;  %v1663_v24 = vld [vmem:[%s3252_s3 + $0x50] sm:$0xff] }
  0x2f   : > { %2312 = vmatmul.mubr.bf16.gmra.mrb[4].mxu0 %v2635_v26  ;;  %2267 = vmatprep.mubr.bf16.mxu1 %v2638_v27  ;;  %v1665_v27 = vld [vmem:[%s3252_s3 + $0x60] sm:$0xff] }
  0x30   : > { %2344 = vmatpush3.bf16.msra.mxu0 %v2636_v25  ;;  %2315 = vmatprep.mubr.bf16.mxu0 %v2639_v28  ;;  %v1664_v25 = vld [vmem:[%s3252_s3 + $0x58] sm:$0xff]  ;;  %v1666_v28 = vld [vmem:[%s3252_s3 + $0x68] sm:$0xff] }
  0x31   : > { %2345 = vmatprep.subr.bf16.mxu0 %v2637_v29  ;;  %2456 = vmatpush3.bf16.msra.mxu1 %v2760_v5  ;;  %v2679_v5 = vld [vmem:[%s2788_s20 + $0x80] sm:$0xff]   ;;  %v2438_v26 = vpack.c.bf16 %v1664_v25, %v1663_v24 }
  0x32   : > { %2449 = vmatprep.subr.bf16.mxu1 %v2772_v7 }
  0x34   : > { %2346 = vmatpush3.bf16.msra.mxu0 %v2637_v29  ;;  %v2441_v29 = vpack.c.bf16 %v1666_v28, %v1665_v27 }
  0x35   : > { %2347 = vmatprep.subr.bf16.mxu0 %v2642_v31  ;;  %2457 = vmatpush3.bf16.msra.mxu1 %v2772_v7  ;;  %v2681_v7 = vld [vmem:[%s2788_s20 + $0x88] sm:$0xff]  }
  0x36   : > { %2268 = vmatmul.mubr.bf16.gmra.mrb[8].mxu1 %v2640_v30  ;;  %2450 = vmatprep.subr.bf16.mxu1 %v2783_v9  ;;  %v1667_v30 = vld [vmem:[%s3252_s3 + $0x70] sm:$0xff] }
  0x37   : > { %2316 = vmatmul.mubr.bf16.gmra.mrb[8].mxu0 %v2641_v32  ;;  %2271 = vmatprep.mubr.bf16.mxu1 %v2644_v33  ;;  %v2696_v33 = vmov 0.0  }
  0x38   : > { %2348 = vmatpush3.bf16.msra.mxu0 %v2642_v31  ;;  %2319 = vmatprep.mubr.bf16.mxu0 %v2645_v34  ;;  %v1668_v31 = vld [vmem:[%s3252_s3 + $0x78] sm:$0xff] }
  0x39   : > { %2349 = vmatprep.subr.bf16.mxu0 %v2643_v35  ;;  %2458 = vmatpush3.bf16.msra.mxu1 %v2783_v9  ;;  %v1654_v9 = vld [vmem:[%s3252_s3 + $0x8] sm:$0xff]  ;;  %v2444_v32 = vpack.c.bf16 %v1668_v31, %v1667_v30 }
  0x3a   : > { %2451 = vmatprep.subr.bf16.mxu1 %v2796_v11  ;;  %v2423_v10 = vpack.c.bf16 %v1654_v9, %v1653_v8 }
  0x3c   : > { %2350 = vmatpush3.bf16.msra.mxu0 %v2643_v35 }
  0x3d   : > { %2351 = vmatprep.subr.bf16.mxu0 %v2648_v37  ;;  %2459 = vmatpush3.bf16.msra.mxu1 %v2796_v11  ;;  %v2694_v11 = vmov 0.0|0.0  }
  0x3e   : > { %2272 = vmatmul.mubr.bf16.gmra.mrb[12].mxu1 %v2646_v36  ;;  %2452 = vmatprep.subr.bf16.mxu1 %v2810_v15 }
  0x3f   : > { %2320 = vmatmul.mubr.bf16.gmra.mrb[12].mxu0 %v2647_v38  ;;  %2275 = vmatprep.mubr.bf16.mxu1 %v2650_v39 }
  0x40   : > { %2352 = vmatpush3.bf16.msra.mxu0 %v2648_v37  ;;  %2355 = vmatprep.mubr.bf16.mxu0 %v2651_v40 }
  0x41   : > { %2353 = vmatprep.subr.bf16.mxu0 %v2649_v41  ;;  %2460 = vmatpush3.bf16.msra.mxu1 %v2810_v15  ;;  %v1657_v15 = vld [vmem:[%s3252_s3 + $0x20] sm:$0xff] }
  0x42   : > { %2453 = vmatprep.subr.bf16.mxu1 %v2820_v17 }
  0x44   : > { %2354 = vmatpush3.bf16.msra.mxu0 %v2649_v41 }
  0x45   : > { %2461 = vmatpush3.bf16.msra.mxu1 %v2820_v17  ;;  %v2429_v17 = vpack.c.bf16 %v1658_v16, %v1657_v15 }
  0x46   : > { %2276 = vmatmul.mubr.bf16.gmra.mrb[16].mxu1 %v2652_v42  ;;  %2422 = vmatprep.subr.bf16.mxu1 %v2694_v11 }
  0x47   : > { %2356 = vmatmul.mubr.bf16.vlgmr.msra.gmra.mrb[0].mxu0 %v2653_v43  ;;  %2279 = vmatprep.mubr.bf16.mxu1 %v2654_v44 }
  0x48   : > { %2359 = vmatprep.mubr.bf16.mxu0 %v2655_v45 }
  0x4e   : > { %2280 = vmatmul.mubr.bf16.gmra.mrb[20].mxu1 %v2656_v46 }
  0x4f   : > { %2360 = vmatmul.mubr.bf16.gmra.mrb[4].mxu0 %v2657_v47  ;;  %2283 = vmatprep.mubr.bf16.mxu1 %v2658_v48 }
  0x50   : > { %2363 = vmatprep.mubr.bf16.mxu0 %v2659_v49 }
  0x56   : > { %2284 = vmatmul.mubr.bf16.gmra.mrb[24].mxu1 %v2660_v50 }
  0x57   : > { %2364 = vmatmul.mubr.bf16.gmra.mrb[8].mxu0 %v2661_v51  ;;  %2287 = vmatprep.mubr.bf16.mxu1 %v2662_v52  ;;  %v2968_v52 = vld [vmem:[%s3251_s2] ss:$0 sm:$0xff] }
  0x58   : > { %2367 = vmatprep.mubr.bf16.mxu0 %v2663_v53 }
  0x5e   : > { %2288 = vmatmul.mubr.bf16.gmra.mrb[28].mxu1 %v2664_v54 }
  0x5f   : > { %2368 = vmatmul.mubr.bf16.gmra.mrb[12].mxu0 %v2665_v55  ;;  %2323 = vmatprep.mubr.bf16.mxu1 %v2666_v56 }
  0x60   : > { %2371 = vmatprep.mubr.bf16.mxu0 %v2667_v57 }
  0x66   : > { %2324 = vmatmul.mubr.bf16.vlgmr.msra.gmra.mrb[16].mxu1 %v2668_v58 }
  0x67   : > { %2372 = vmatmul.mubr.bf16.gmra.mrb[16].mxu0 %v2669_v59  ;;  %2327 = vmatprep.mubr.bf16.mxu1 %v2670_v60 }
  0x68   : > { %2375 = vmatprep.mubr.bf16.mxu0 %v2671_v61  ;;  %2424 = vmatpush3.bf16.msra.mxu1 %v2423_v10 }
  0x69   : > { %2425 = vmatprep.subr.bf16.mxu1 %v2694_v11 }
  0x6c   : > { %2427 = vmatpush3.bf16.msra.mxu1 %v2426_v14 }
  0x6d   : > { %2428 = vmatprep.subr.bf16.mxu1 %v2694_v11 }
  0x6e   : > { %2328 = vmatmul.mubr.bf16.gmra.mrb[20].mxu1 %v2672_v62 }
  0x6f   : > { %2376 = vmatmul.mubr.bf16.gmra.mrb[20].mxu0 %v2673_v63  ;;  %2331 = vmatprep.mubr.bf16.mxu1 %v2674_v0 }
  0x70   : > { %2379 = vmatprep.mubr.bf16.mxu0 %v2675_v1  ;;  %2430 = vmatpush3.bf16.msra.mxu1 %v2429_v17 }
  0x71   : > { %2431 = vmatprep.subr.bf16.mxu1 %v2694_v11 }
  0x74   : > { %2433 = vmatpush3.bf16.msra.mxu1 %v2432_v20 }
  0x75   : > { %2434 = vmatprep.subr.bf16.mxu1 %v2694_v11 }
  0x76   : > { %2332 = vmatmul.mubr.bf16.gmra.mrb[24].mxu1 %v2676_v2 }
  0x77   : > { %2380 = vmatmul.mubr.bf16.gmra.mrb[24].mxu0 %v2677_v3  ;;  %2335 = vmatprep.mubr.bf16.mxu1 %v2678_v4 }
  0x78   : > { %2383 = vmatprep.mubr.bf16.mxu0 %v2679_v5  ;;  %2436 = vmatpush3.bf16.msra.mxu1 %v2435_v23 }
  0x79   : > { %2437 = vmatprep.subr.bf16.mxu1 %v2694_v11 }
  0x7c   : > { %2439 = vmatpush3.bf16.msra.mxu1 %v2438_v26 }
  0x7d   : > { %2440 = vmatprep.subr.bf16.mxu1 %v2694_v11 }
  0x7e   : > { %2336 = vmatmul.mubr.bf16.gmra.mrb[28].mxu1 %v2680_v6 }
  0x7f   : > { %2384 = vmatmul.mubr.bf16.gmra.mrb[28].mxu0 %v2681_v7  ;;  %2419 = vmatprep.mubr.msk.f32.mxu1 %vm2695_vm0, %v2696_v33 }
  0x80   : > { %2442 = vmatpush3.bf16.msra.mxu1 %v2441_v29 }
  0x81   : > { %2443 = vmatprep.subr.bf16.mxu1 %v2694_v11 }
  0x84   : > { %2445 = vmatpush3.bf16.msra.mxu1 %v2444_v32 }
  0xf9   : > { %v2261_v34 = vpop.f32.mrb[0].mxu1 }
  0xfa   : > { %v452_v35 = vpop.f32.mrb[1].mxu1 }
  0xfb   : > { %v2262_v36 = vpop.f32.mrb[2].mxu1 }
  0xfc   : > { %v455_v37 = vpop.f32.mrb[3].mxu1 }
 0x101   : > { %v2265_v38 = vpop.f32.mrb[4].mxu1 }
 0x102   : > { %v468_v39 = vpop.f32.mrb[5].mxu1 }
 0x103   : > { %v2266_v40 = vpop.f32.mrb[6].mxu1 }
 0x104   : > { %v471_v41 = vpop.f32.mrb[7].mxu1 }
 0x109   : > { %v2269_v42 = vpop.f32.mrb[8].mxu1 }
 0x10a   : > { %v484_v43 = vpop.f32.mrb[9].mxu1 }
 0x10b   : > { %v2270_v44 = vpop.f32.mrb[10].mxu1 }
 0x10c   : > { %v487_v45 = vpop.f32.mrb[11].mxu1 }
 0x111   : > { %v2273_v46 = vpop.f32.mrb[12].mxu1 }
 0x112   : > { %v2959_v47 = vpop.f32.mrb[13].mxu1 }
 0x113   : > { %v2961_v48 = vpop.f32.mrb[14].mxu1 }
 0x114   : > { %v2963_v49 = vpop.f32.mrb[15].mxu1 }
 0x11a   : > { %v2357_v50 = vpop.f32.mrb[0].mxu0 }
 0x11b   : > { %v2462_v51 = vadd.f32 %v2357_v50, %v2261_v34  ;;  %v1322_v53 = vpop.f32.mrb[1].mxu0 }
 0x11c   : > { %v2463_v54 = vadd.f32 %v1322_v53, %v452_v35  ;;  %v2358_v55 = vpop.f32.mrb[2].mxu0 }
 0x11d   : > { %v2464_v56 = vadd.f32 %v2358_v55, %v2262_v36  ;;  %v1325_v57 = vpop.f32.mrb[3].mxu0  ;;  %v2974_v60 = vadd.f32 %v2462_v51, %v2968_v52 }
 0x11e   : > { %v2971_v58 = vadd.f32 %v2463_v54, %v2968_v52  ;;  %v2465_v59 = vadd.f32 %v1325_v57, %v455_v37 }
 0x11f   : > { %v2981_v63 = vadd.f32 %v2464_v56, %v2968_v52  ;;  %v1586_v4 = vmax.f32 %v2974_v60, 0.0 }
 0x120   : > { %v2977_v61 = vadd.f32 %v2465_v59, %v2968_v52  ;;  %v1584_v62 = vmax.f32 %v2971_v58, 0.0 }
 0x121   : > { %v1587_v10 = vmax.f32 %v2981_v63, 0.0 }
 0x122   : > { %v1585_v0 = vmax.f32 %v2977_v61, 0.0  ;;  %v2361_v1 = vpop.f32.mrb[4].mxu0 }
 0x123   : > { %v2466_v2 = vadd.f32 %v2361_v1, %v2265_v38  ;;  %v1338_v3 = vpop.f32.mrb[5].mxu0 }
 0x124   : > { %v1616_v5 = vadd.f32 %v1585_v0, %v1584_v62  ;;  %v2467_v6 = vadd.f32 %v1338_v3, %v468_v39  ;;  %v2362_v7 = vpop.f32.mrb[6].mxu0 }
 0x125   : > { %v2468_v8 = vadd.f32 %v2362_v7, %v2266_v40  ;;  %v1341_v9 = vpop.f32.mrb[7].mxu0  ;;  %v2996_v14 = vadd.f32 %v2466_v2, %v2968_v52 }
 0x126   : > { %v1617_v11 = vadd.f32 %v1616_v5, %v1586_v4  ;;  %v2993_v12 = vadd.f32 %v2467_v6, %v2968_v52  ;;  %v2469_v13 = vadd.f32 %v1341_v9, %v471_v41 }
 0x127   : > { %v3007_v19 = vadd.f32 %v2468_v8, %v2968_v52  ;;  %v1590_v24 = vmax.f32 %v2996_v14, 0.0 }
 0x128   : > { %v1588_v15 = vmax.f32 %v2993_v12, 0.0  ;;  %v1618_v16 = vadd.f32 %v1617_v11, %v1587_v10  ;;  %v3002_v17 = vadd.f32 %v2469_v13, %v2968_v52 }
 0x129   : > { %v1591_v30 = vmax.f32 %v3007_v19, 0.0 }
 0x12a   : > { %v1619_v18 = vadd.f32 %v1618_v16, %v1588_v15  ;;  %v1589_v20 = vmax.f32 %v3002_v17, 0.0  ;;  %v2365_v21 = vpop.f32.mrb[8].mxu0 }
 0x12b   : > { %v2470_v22 = vadd.f32 %v2365_v21, %v2269_v42  ;;  %v1354_v23 = vpop.f32.mrb[9].mxu0 }
 0x12c   : > { %v1620_v25 = vadd.f32 %v1619_v18, %v1589_v20  ;;  %v2471_v26 = vadd.f32 %v1354_v23, %v484_v43  ;;  %v2366_v27 = vpop.f32.mrb[10].mxu0 }
 0x12d   : > { %v2472_v28 = vadd.f32 %v2366_v27, %v2270_v44  ;;  %v1357_v29 = vpop.f32.mrb[11].mxu0  ;;  %v3020_v34 = vadd.f32 %v2470_v22, %v2968_v52 }
 0x12e   : > { %v1621_v31 = vadd.f32 %v1620_v25, %v1590_v24  ;;  %v3017_v32 = vadd.f32 %v2471_v26, %v2968_v52  ;;  %v2473_v33 = vadd.f32 %v1357_v29, %v487_v45 }
 0x12f   : > { %v3031_v39 = vadd.f32 %v2472_v28, %v2968_v52  ;;  %v3260_v44 = vmax.f32 %v3020_v34, 0.0 }
 0x130   : > { %v3263_v35 = vmax.f32 %v3017_v32, 0.0  ;;  %v1622_v36 = vadd.f32 %v1621_v31, %v1591_v30  ;;  %v3026_v37 = vadd.f32 %v2473_v33, %v2968_v52 }
 0x131   : > { %v3259_v55 = vmax.f32 %v3031_v39, 0.0 }
 0x132   : > { %v1623_v38 = vadd.f32 %v1622_v36, %v3263_v35  ;;  %v3261_v40 = vmax.f32 %v3026_v37, 0.0  ;;  %v2369_v41 = vpop.f32.mrb[12].mxu0 }
 0x133   : > { %v2474_v42 = vadd.f32 %v2369_v41, %v2273_v46  ;;  %v1370_v43 = vpop.f32.mrb[13].mxu0 }
 0x134   : > { %v1624_v45 = vadd.f32 %v1623_v38, %v3261_v40  ;;  %v2475_v50 = vadd.f32 %v1370_v43, %v2959_v47  ;;  %v2370_v51 = vpop.f32.mrb[14].mxu0 }
 0x135   : > { %v2476_v53 = vadd.f32 %v2370_v51, %v2961_v48  ;;  %v1373_v54 = vpop.f32.mrb[15].mxu0  ;;  %v3047_v59 = vadd.f32 %v2474_v42, %v2968_v52 }
 0x136   : > { %v1625_v56 = vadd.f32 %v1624_v45, %v3260_v44  ;;  %v3043_v57 = vadd.f32 %v2475_v50, %v2968_v52  ;;  %v2477_v46 = vadd.f32 %v1373_v54, %v2963_v49 }
 0x137   : > { %v3058_v5 = vadd.f32 %v2476_v53, %v2968_v52  ;;  %v3256_v13 = vmax.f32 %v3047_v59, 0.0 }
 0x138   : > { %v3258_v1 = vmax.f32 %v3043_v57, 0.0  ;;  %v1626_v47 = vadd.f32 %v1625_v56, %v3259_v55  ;;  %v3053_v48 = vadd.f32 %v2477_v46, %v2968_v52 }
 0x139   : > { %v2325_v2 = vpop.f32.mrb[16].mxu1  ;;  %v3255_v26 = vmax.f32 %v3058_v5, 0.0 }
 0x13a   : > { %v1627_v3 = vadd.f32 %v1626_v47, %v3258_v1  ;;  %v3257_v49 = vmax.f32 %v3053_v48, 0.0  ;;  %v2373_v6 = vpop.f32.mrb[16].mxu0  ;;  %v935_v7 = vpop.f32.mrb[17].mxu1 }
 0x13b   : > { %v2478_v8 = vadd.f32 %v2373_v6, %v2325_v2  ;;  %v1386_v9 = vpop.f32.mrb[17].mxu0  ;;  %v2326_v11 = vpop.f32.mrb[18].mxu1 }
 0x13c   : > { %v1628_v16 = vadd.f32 %v1627_v3, %v3257_v49  ;;  %v2479_v18 = vadd.f32 %v1386_v9, %v935_v7  ;;  %v2374_v21 = vpop.f32.mrb[18].mxu0  ;;  %v938_v22 = vpop.f32.mrb[19].mxu1 }
 0x13d   : > { %v2480_v23 = vadd.f32 %v2374_v21, %v2326_v11  ;;  %v1389_v25 = vpop.f32.mrb[19].mxu0  ;;  %v3071_v31 = vadd.f32 %v2478_v8, %v2968_v52 }
 0x13e   : > { %v1629_v27 = vadd.f32 %v1628_v16, %v3256_v13  ;;  %v3068_v28 = vadd.f32 %v2479_v18, %v2968_v52  ;;  %v2481_v29 = vadd.f32 %v1389_v25, %v938_v22 }
 0x13f   : > { %v3082_v43 = vadd.f32 %v2480_v23, %v2968_v52  ;;  %v1602_v46 = vmax.f32 %v3071_v31, 0.0 }
 0x140   : > { %v1600_v33 = vmax.f32 %v3068_v28, 0.0  ;;  %v1630_v36 = vadd.f32 %v1629_v27, %v3255_v26  ;;  %v3077_v38 = vadd.f32 %v2481_v29, %v2968_v52 }
 0x141   : > { %v2329_v41 = vpop.f32.mrb[20].mxu1  ;;  %v1603_v9 = vmax.f32 %v3082_v43, 0.0 }
 0x142   : > { %v1631_v42 = vadd.f32 %v1630_v36, %v1600_v33  ;;  %v1601_v45 = vmax.f32 %v3077_v38, 0.0  ;;  %v2377_v50 = vpop.f32.mrb[20].mxu0  ;;  %v951_v51 = vpop.f32.mrb[21].mxu1 }
 0x143   : > { %v2482_v53 = vadd.f32 %v2377_v50, %v2329_v41  ;;  %v1402_v54 = vpop.f32.mrb[21].mxu0  ;;  %v2330_v56 = vpop.f32.mrb[22].mxu1 }
 0x144   : > { %v1632_v47 = vadd.f32 %v1631_v42, %v1601_v45  ;;  %v2483_v2 = vadd.f32 %v1402_v54, %v951_v51  ;;  %v2378_v3 = vpop.f32.mrb[22].mxu0  ;;  %v954_v6 = vpop.f32.mrb[23].mxu1 }
 0x145   : > { %v2484_v7 = vadd.f32 %v2378_v3, %v2330_v56  ;;  %v1405_v8 = vpop.f32.mrb[23].mxu0  ;;  %v3095_v21 = vadd.f32 %v2482_v53, %v2968_v52 }
 0x146   : > { %v1633_v11 = vadd.f32 %v1632_v47, %v1602_v46  ;;  %v3092_v16 = vadd.f32 %v2483_v2, %v2968_v52  ;;  %v2485_v18 = vadd.f32 %v1405_v8, %v954_v6 }
 0x147   : > { %v3106_v36 = vadd.f32 %v2484_v7, %v2968_v52  ;;  %v1606_v56 = vmax.f32 %v3095_v21, 0.0 }
 0x148   : > { %v1604_v22 = vmax.f32 %v3092_v16, 0.0  ;;  %v1634_v23 = vadd.f32 %v1633_v11, %v1603_v9  ;;  %v3101_v25 = vadd.f32 %v2485_v18, %v2968_v52  ;;  %v3274_v16 = vmax.f32 %v3026_v37, 0.0 }
 0x149   : > { %v2333_v27 = vpop.f32.mrb[24].mxu1  ;;  %v3270_v7 = vmax.f32 %v3106_v36, 0.0  ;;  %v3271_v43 = vmax.f32 %v3106_v36, 0.0 }
 0x14a   : > { %v1635_v29 = vadd.f32 %v1634_v23, %v1604_v22  ;;  %v1605_v41 = vmax.f32 %v3101_v25, 0.0  ;;  %v2381_v42 = vpop.f32.mrb[24].mxu0  ;;  %v967_v50 = vpop.f32.mrb[25].mxu1  ;;  %v3276_v25 = vmax.f32 %v3020_v34, 0.0 }
 0x14b   : > { %v2486_v51 = vadd.f32 %v2381_v42, %v2333_v27  ;;  %v1418_v53 = vpop.f32.mrb[25].mxu0  ;;  %v2334_v54 = vpop.f32.mrb[26].mxu1 }
 0x14c   : > { %v1636_v47 = vadd.f32 %v1635_v29, %v1605_v41  ;;  %v2487_v2 = vadd.f32 %v1418_v53, %v967_v50  ;;  %v2382_v3 = vpop.f32.mrb[26].mxu0  ;;  %v970_v6 = vpop.f32.mrb[27].mxu1 }
 0x14d   : > { %v2488_v8 = vadd.f32 %v2382_v3, %v2334_v54  ;;  %v1421_v11 = vpop.f32.mrb[27].mxu0  ;;  %v3119_v42 = vadd.f32 %v2486_v51, %v2968_v52 }
 0x14e   : > { %v1637_v18 = vadd.f32 %v1636_v47, %v1606_v56  ;;  %v3116_v23 = vadd.f32 %v2487_v2, %v2968_v52  ;;  %v2489_v27 = vadd.f32 %v1421_v11, %v970_v6 }
 0x14f   : > { %v3130_v47 = vadd.f32 %v2488_v8, %v2968_v52  ;;  %v3267_v49 = vmax.f32 %v3119_v42, 0.0 }
 0x150   : > { %v3262_v26 = vmax.f32 %v3116_v23, 0.0  ;;  %v1638_v29 = vadd.f32 %v1637_v18, %v3270_v7  ;;  %v3125_v50 = vadd.f32 %v2489_v27, %v2968_v52  ;;  %v1746_v7 = vlaneseq }
 0x151   : > { %v2337_v53 = vpop.f32.mrb[28].mxu1  ;;  %v3265_v8 = vmax.f32 %v3130_v47, 0.0 }
 0x152   : > { %v1639_v54 = vadd.f32 %v1638_v29, %v3262_v26  ;;  %v3268_v2 = vmax.f32 %v3125_v50, 0.0  ;;  %v2385_v3 = vpop.f32.mrb[28].mxu0  ;;  %v983_v51 = vpop.f32.mrb[29].mxu1 }
 0x153   : > { %v2490_v6 = vadd.f32 %v2385_v3, %v2337_v53  ;;  %v1434_v11 = vpop.f32.mrb[29].mxu0  ;;  %v2338_v13 = vpop.f32.mrb[30].mxu1 }
 0x154   : > { %v1640_v18 = vadd.f32 %v1639_v54, %v3268_v2  ;;  %v2491_v27 = vadd.f32 %v1434_v11, %v983_v51  ;;  %v2386_v1 = vpop.f32.mrb[30].mxu0  ;;  %v986_v55 = vpop.f32.mrb[31].mxu1 }
 0x155   : > { %v2492_v44 = vadd.f32 %v2386_v1, %v2338_v13  ;;  %v1437_v29 = vpop.f32.mrb[31].mxu0  ;;  %v3143_v3 = vadd.f32 %v2490_v6, %v2968_v52 }
 0x156   : > { %v1641_v40 = vadd.f32 %v1640_v18, %v3267_v49  ;;  %v3140_v26 = vadd.f32 %v2491_v27, %v2968_v52  ;;  %v2493_v53 = vadd.f32 %v1437_v29, %v986_v55 }
 0x157   : > { %v3154_v51 = vadd.f32 %v2492_v44, %v2968_v52  ;;  %v3269_v55 = vmax.f32 %v3143_v3, 0.0 }
 0x158   : > { %v3264_v35 = vmax.f32 %v3140_v26, 0.0  ;;  %v1642_v54 = vadd.f32 %v1641_v40, %v3265_v8  ;;  %v3149_v1 = vadd.f32 %v2493_v53, %v2968_v52  ;;  %v1669_v8 = vld [vmem:[%s3253_s4] sm:$0x1] }
 0x159   : > { %v1615_v18 = vmax.f32 %v3154_v51, 0.0 }
 0x15a   : > { %v1643_v13 = vadd.f32 %v1642_v54, %v3264_v35  ;;  %v3266_v11 = vmax.f32 %v3149_v1, 0.0 }
 0x15c   : > { %v1644_v6 = vadd.f32 %v1643_v13, %v3266_v11 }
 0x15e   : > { %v1645_v40 = vadd.f32 %v1644_v6, %v3269_v55 }
 0x160   : > { %v1646_v27 = vadd.f32 %v1645_v40, %v1615_v18  ;;  %v1747_v40 = vshrl.u32 %v1746_v7, 7 }
 0x162   : > { %v1647_v29 = vrot.slane %v1646_v27, 4 }
 0x164   : > { %v1648_v53 = vadd.f32 %v1647_v29, %v1646_v27  ;;  %v1748_v27 = vsub.s32 0, %v1747_v40  ;;  %v3281_v40 = vmax.f32 %v3140_v26, 0.0 }
 0x166   : > { %v1649_v54 = vrot.slane %v1648_v53, 2 }
 0x168   : > { %v1650_v52 = vadd.f32 %v1649_v54, %v1648_v53 }
 0x16a   : > { %v1651_v44 = vrot.slane %v1650_v52, 1 }
 0x16c   : > { %v1652_v35 = vadd.f32 %v1651_v44, %v1650_v52  ;;  %v3279_v44 = vmax.f32 %v3130_v47, 0.0 }
 0x16e   : > { %2420 = vmatmul.mubr.f32.vlgmr.msra.gmra.mrb[32].mxu1 %v1652_v35 }
 0x241   : > { %v1736_v13 = vpop.f32.mrb[32].mxu1 }
 0x242   : > { %v1737_v11 = vadd.f32 %v1736_v13, %v1669_v8  ;;  %v2421_v49 = vpop.f32.mrb[33].mxu1 }
 0x244   : > { %v2134_v2 = vmul.f32 -1.442695, %v1737_v11 }
 0x246   : > { %2682 = vpow2.f32 %v2134_v2 }
 0x250   : > { %v2683_v6 = vpop.eup %2682 }
 0x251   : > { %v1743_v55 = vadd.f32 1.0, %v2683_v6 }
 0x253   : > { %2684 = vrcp.f32 %v1743_v55 }
 0x25d   : > { %v2685_v29 = vpop.eup %2684 }
 0x25e   : > { %v1749_v53 = vrot.slane %v2685_v29, %v1748_v27  ;;  %v3282_v27 = vmax.f32 %v3053_v48, 0.0 }
 0x260   : > { %v1750_v35 = vmul.f32 %v1749_v53, %v1584_v62  ;;  %v1766_v54 = vmul.f32 %v1749_v53, %v1600_v33  ;;  %v1751_v49 = vmul.f32 %v1749_v53, %v1585_v0  ;;  %v1767_v2 = vmul.f32 %v1749_v53, %v1601_v45 }
 0x261   : > { %v1752_v7 = vmul.f32 %v1749_v53, %v1586_v4  ;;  %v1768_v11 = vmul.f32 %v1749_v53, %v1602_v46  ;;  %v1753_v62 = vmul.f32 %v1749_v53, %v1587_v10  ;;  %v1769_v61 = vmul.f32 %v1749_v53, %v1603_v9 }
 0x262   : > { %v2538_v52 = vpack.i.bf16 %v1766_v54, %v1750_v35  ;;  %v2540_v8 = vpack.i.bf16 %v1767_v2, %v1751_v49  ;;  %v1754_v28 = vmul.f32 %v1749_v53, %v1588_v15  ;;  %v1770_v60 = vmul.f32 %v1749_v53, %v1604_v22 }
 0x263   : > { %v2542_v58 = vpack.i.bf16 %v1768_v11, %v1752_v7  ;;  %v2544_v0 = vpack.i.bf16 %v1769_v61, %v1753_v62  ;;  %v1755_v31 = vmul.f32 %v1749_v53, %v1589_v20  ;;  %v1771_v63 = vmul.f32 %v1749_v53, %v1605_v41 }
 0x264   : > { %2539 = vxpose.xlu0.b32.start [1/16] (narrow) %v2538_v52, 64  ;;  %v2546_v4 = vpack.i.bf16 %v1770_v60, %v1754_v28  ;;  %v1756_v33 = vmul.f32 %v1749_v53, %v1590_v24  ;;  %v1772_v12 = vmul.f32 %v1749_v53, %v1606_v56  ;;  %v1757_v38 = vmul.f32 %v1749_v53, %v1591_v30 }
 0x265   : > { %v2548_v10 = vpack.i.bf16 %v1771_v63, %v1755_v31  ;;  %v1773_v17 = vmul.f32 %v1749_v53, %v3271_v43  ;;  %v3272_v45 = vmax.f32 %v3017_v32, 0.0  ;;  %v3273_v9 = vmax.f32 %v3116_v23, 0.0 }
 0x266   : > { %v2550_v15 = vpack.i.bf16 %v1772_v12, %v1756_v33  ;;  %v1759_v21 = vmul.f32 %v1749_v53, %v3274_v16  ;;  %v3275_v22 = vmax.f32 %v3125_v50, 0.0  ;;  %v1760_v36 = vmul.f32 %v1749_v53, %v3276_v25 }
 0x267   : > { %v2552_v20 = vpack.i.bf16 %v1773_v17, %v1757_v38  ;;  %v1758_v46 = vmul.f32 %v1749_v53, %v3272_v45  ;;  %v1774_v14 = vmul.f32 %v1749_v53, %v3273_v9  ;;  %v3277_v41 = vmax.f32 %v3119_v42, 0.0 }
 0x268   : > { %2541 = vxpose.xlu0.b32.cont [2/16] (narrow) %v2540_v8, 64  ;;  %v1775_v19 = vmul.f32 %v1749_v53, %v3275_v22  ;;  %v3278_v23 = vmax.f32 %v3031_v39, 0.0  ;;  %v1777_v37 = vmul.f32 %v1749_v53, %v3279_v44  ;;  %v3280_v50 = vmax.f32 %v3043_v57, 0.0 }
 0x269   : > { %v2554_v24 = vpack.i.bf16 %v1774_v14, %v1758_v46  ;;  %v1776_v32 = vmul.f32 %v1749_v53, %v3277_v41  ;;  %v1778_v34 = vmul.f32 %v1749_v53, %v3281_v40  ;;  %v1763_v29 = vmul.f32 %v1749_v53, %v3282_v27 }
 0x26a   : > { %v2556_v30 = vpack.i.bf16 %v1775_v19, %v1759_v21  ;;  %v1761_v55 = vmul.f32 %v1749_v53, %v3278_v23  ;;  %v1762_v6 = vmul.f32 %v1749_v53, %v3280_v50  ;;  %v3283_v39 = vmax.f32 %v3149_v1, 0.0 }
 0x26b   : > { %v2558_v56 = vpack.i.bf16 %v1776_v32, %v1760_v36  ;;  %v3284_v54 = vmax.f32 %v3047_v59, 0.0  ;;  %v3285_v57 = vmax.f32 %v3143_v3, 0.0  ;;  %v3286_v2 = vmax.f32 %v3058_v5, 0.0 }
 0x26c   : > { %2543 = vxpose.xlu0.b32.cont [3/16] (narrow) %v2542_v58, 64  ;;  %v2560_v13 = vpack.i.bf16 %v1777_v37, %v1761_v55  ;;  %v2562_v42 = vpack.i.bf16 %v1778_v34, %v1762_v6  ;;  %v1779_v35 = vmul.f32 %v1749_v53, %v3283_v39  ;;  %v1781_v48 = vmul.f32 %v1749_v53, %v1615_v18 }
 0x26d   : > { %v1764_v52 = vmul.f32 %v1749_v53, %v3284_v54  ;;  %v1780_v49 = vmul.f32 %v1749_v53, %v3285_v57  ;;  %v1765_v8 = vmul.f32 %v1749_v53, %v3286_v2 }
 0x26e   : > { %v2564_v47 = vpack.i.bf16 %v1779_v35, %v1763_v29 }
 0x26f   : > { %v2566_v26 = vpack.i.bf16 %v1780_v49, %v1764_v52  ;;  %v2568_v7 = vpack.i.bf16 %v1781_v48, %v1765_v8 }
 0x270   : > { %2545 = vxpose.xlu0.b32.cont [4/16] (narrow) %v2544_v0, 64 }
 0x274   : > { %2547 = vxpose.xlu0.b32.cont [5/16] (narrow) %v2546_v4, 64 }
 0x278   : > { %2549 = vxpose.xlu0.b32.cont [6/16] (narrow) %v2548_v10, 64 }
 0x27c   : > { %2551 = vxpose.xlu0.b32.cont [7/16] (narrow) %v2550_v15, 64 }
 0x280   : > { %2553 = vxpose.xlu0.b32.cont [8/16] (narrow) %v2552_v20, 64 }
 0x284   : > { %2555 = vxpose.xlu0.b32.cont [9/16] (narrow) %v2554_v24, 64 }
 0x288   : > { %2557 = vxpose.xlu0.b32.cont [10/16] (narrow) %v2556_v30, 64 }
 0x28c   : > { %2559 = vxpose.xlu0.b32.cont [11/16] (narrow) %v2558_v56, 64 }
 0x290   : > { %2561 = vxpose.xlu0.b32.cont [12/16] (narrow) %v2560_v13, 64 }
 0x294   : > { %2563 = vxpose.xlu0.b32.cont [13/16] (narrow) %v2562_v42, 64 }
 0x298   : > { %2565 = vxpose.xlu0.b32.cont [14/16] (narrow) %v2564_v47, 64 }
 0x29c   : > { %2567 = vxpose.xlu0.b32.cont [15/16] (narrow) %v2566_v26, 64 }
 0x2a0   : > { %2569 = vxpose.xlu0.b32.end [16/16] (narrow) %v2568_v7, 64 }
 0x2e4   : > { %v2570_v1 = vpop.trf.xlu0 }
 0x2e5   : > { %v2574_v11 = vunpack.i.h.bf16 %v2570_v1  ;;  %v2571_v58 = vunpack.i.l.bf16 %v2570_v1 }
 0x2e7   : > { %v2146_v59 = vpack.c.bf16 %v2574_v11, %v2571_v58 }
 0x2e8   : > { %v2575_v5 = vpop.trf.xlu0 }
 0x2e9   : > { %1894 = vst [vmem:[%s3236_s17] sm:$0xff] %v2146_v59  ;;  %v2579_v3 = vunpack.i.h.bf16 %v2575_v5  ;;  %v2576_v51 = vunpack.i.l.bf16 %v2575_v5 }
 0x2eb   : > { %v2147_v18 = vpack.c.bf16 %v2579_v3, %v2576_v51 }
 0x2ec   : > { %v2580_v53 = vpop.trf.xlu0 }
 0x2ed   : > { %1895 = vst [vmem:[%s3236_s17 + $0x8] sm:$0xff] %v2147_v18  ;;  %v2584_v62 = vunpack.i.h.bf16 %v2580_v53  ;;  %v2581_v61 = vunpack.i.l.bf16 %v2580_v53 }
 0x2ef   : > { %v2148_v0 = vpack.c.bf16 %v2584_v62, %v2581_v61 }
 0x2f0   : > { %v2585_v28 = vpop.trf.xlu0 }
 0x2f1   : > { %1896 = vst [vmem:[%s3236_s17 + $0x10] sm:$0xff] %v2148_v0  ;;  %v2589_v60 = vunpack.i.h.bf16 %v2585_v28  ;;  %v2586_v4 = vunpack.i.l.bf16 %v2585_v28 }
 0x2f3   : > { %v2149_v31 = vpack.c.bf16 %v2589_v60, %v2586_v4 }
 0x2f4   : > { %v2590_v63 = vpop.trf.xlu0 }
 0x2f5   : > { %1897 = vst [vmem:[%s3236_s17 + $0x18] sm:$0xff] %v2149_v31  ;;  %v2594_v10 = vunpack.i.h.bf16 %v2590_v63  ;;  %v2591_v33 = vunpack.i.l.bf16 %v2590_v63 }
 0x2f7   : > { %v2150_v12 = vpack.c.bf16 %v2594_v10, %v2591_v33 }
 0x2f8   : > { %v2595_v15 = vpop.trf.xlu0 }
 0x2f9   : > { %1898 = vst [vmem:[%s3236_s17 + $0x20] sm:$0xff] %v2150_v12  ;;  %v2599_v38 = vunpack.i.h.bf16 %v2595_v15  ;;  %v2596_v43 = vunpack.i.l.bf16 %v2595_v15 }
 0x2fb   : > { %v2151_v17 = vpack.c.bf16 %v2599_v38, %v2596_v43 }
 0x2fc   : > { %v2600_v20 = vpop.trf.xlu0 }
 0x2fd   : > { %1899 = vst [vmem:[%s3236_s17 + $0x28] sm:$0xff] %v2151_v17  ;;  %v2604_v45 = vunpack.i.h.bf16 %v2600_v20  ;;  %v2601_v46 = vunpack.i.l.bf16 %v2600_v20 }
 0x2ff   : > { %v2152_v9 = vpack.c.bf16 %v2604_v45, %v2601_v46 }
 0x300   : > { %v2605_v14 = vpop.trf.xlu0 }
 0x301   : > { %1900 = vst [vmem:[%s3236_s17 + $0x30] sm:$0xff] %v2152_v9  ;;  %v2609_v24 = vunpack.i.h.bf16 %v2605_v14  ;;  %v2606_v16 = vunpack.i.l.bf16 %v2605_v14 }
 0x303   : > { %v2153_v21 = vpack.c.bf16 %v2609_v24, %v2606_v16 }
 0x305   : > { %1901 = vst [vmem:[%s3236_s17 + $0x38] sm:$0xff] %v2153_v21 }
 0x306 PF: > { %s15_s18 = sadd.s32 1, %s2692_s18  }
 0x307   : > { %p12_p4 = scmp.ge.s32.totalorder %s15_s18, 4  }
 0x309   :  { %14 = sbr.rel (!%p12_p4) target bundleno = 1 (0x1), region = 74 }

</bundles_post_ra>
